<compile_context>
chip_gen: v7x
topology: tpu7x:2x2x1
jax: 0.10.0
libtpu: 0.0.40
codegen_flags: <defaults>
</compile_context>

<pallas_src>
import math
from functools import partial

import jax
import jax.numpy as jnp
from jax.experimental import pallas as pl
from jax.experimental.pallas import tpu as pltpu


def _round_up(x, m):
    return ((x + m - 1) // m) * m


# -----------------------------------------------------------------------------
# Elementwise helpers (usable both inside the kernel and in the JAX reference).
# -----------------------------------------------------------------------------
def _gelu_tanh(x):
    # tanh-form GELU: tanh runs on the EUP slot (otherwise idle in this kernel).
    c = 0.7978845608028654  # sqrt(2/pi)
    return 0.5 * x * (1.0 + jnp.tanh(c * (x + 0.044715 * x * x * x)))


# -----------------------------------------------------------------------------
# Fused  im2col-matmul + bias + channels_first LayerNorm + (optional) GELU
# -----------------------------------------------------------------------------
def _fused_conv_ln_kernel(x_ref, w_ref, b_ref, g_ref, beta_ref, o_ref,
                          *, eps, apply_gelu, inv_c):
    # x_ref: (tm, KP) bf16 patches; w_ref: (KP, C) bf16; b/g/beta: (1, C) f32.
    # Padded K rows of w are zero, so they contribute nothing to the matmul.
    y = jnp.dot(x_ref[...], w_ref[...], preferred_element_type=jnp.float32)
    y = y + b_ref[...]

    # channels_first LayerNorm of the PyTorch module: per spatial location,
    # normalize over the channel axis (biased variance), then affine.
    # Single-pass E[y^2]-mean^2 form: there are no padded output columns, so
    # no lane mask / iota is needed (saves several VALU ops per tile).
    s1 = jnp.sum(y, axis=-1, keepdims=True)
    s2 = jnp.sum(y * y, axis=-1, keepdims=True)
    mean = s1 * inv_c
    var = jnp.maximum(s2 * inv_c - mean * mean, 0.0)   # guard tiny cancellation
    y = (y - mean) * jax.lax.rsqrt(var + eps)
    y = y * g_ref[...] + beta_ref[...]
    if apply_gelu:
        y = _gelu_tanh(y)
    o_ref[...] = y.astype(o_ref.dtype)


def _pick_row_tile(m):
    """Row-tile (M axis) heuristic.

    Large M: big tiles (amortize ~0.35us/step overhead, long contiguous DMAs).
    Small/medium M: keep >= 2 grid steps so the 'parallel' axis can be sharded
    across v7x's two TensorCores.  Always a multiple of 8 (sublane).
    """
    if m >= 4096:
        return 1024
    if m >= 1024:
        return 512
    if m >= 32:
        return _round_up((m + 1) // 2, 16)
    return max(8, _round_up(m, 8))


def conv_ln_act_nhwc(x_nhwc, w_oihw, bias, gamma, beta,
                     *, stride, padding, apply_gelu, eps=1e-6):
    """Conv2d(stride, padding) + LayerNorm(channels_first) + optional GELU.

    Input/output are NHWC (channels-last), output dtype bf16.  Matmul operands
    are bf16, all post-matmul math (LN, GELU) is f32 inside the kernel.
    """
    n, h, wd, cin = x_nhwc.shape
    cout, cin2, kh, kw = w_oihw.shape
    assert cin == cin2
    ho = (h + 2 * padding - kh) // stride + 1
    wo = (wd + 2 * padding - kw) // stride + 1
    K = kh * kw * cin
    M = n * ho * wo

    # K padded only to the bf16 sublane multiple (16), NOT 128 -- the kernel
    # block spans the full K axis (allowed: block dim == full array dim), so
    # lane-dense 128 padding of the patch array is unnecessary HBM traffic.
    KP = _round_up(K, 16)
    tm = _pick_row_tile(M)
    grid = (pl.cdiv(M, tm),)

    # ---- glue: pad, im2col in bf16 (no-op cast after the first layer) -------
    xb = x_nhwc.astype(jnp.bfloat16)
    if padding:
        xb = jnp.pad(xb, ((0, 0), (padding, padding), (padding, padding), (0, 0)))
    patches = jnp.concatenate(
        [xb[:, ky:ky + ho * stride:stride, kx:kx + wo * stride:stride, :]
         for ky in range(kh) for kx in range(kw)],
        axis=-1,
    ).reshape(M, K)                          # patch-channel order = (ky, kx, ci)
    if KP != K:
        patches = jnp.pad(patches, ((0, 0), (0, KP - K)))

    w2d = jnp.transpose(w_oihw, (2, 3, 1, 0)).reshape(K, cout).astype(jnp.bfloat16)
    if KP != K:
        w2d = jnp.pad(w2d, ((0, KP - K), (0, 0)))
    b2d = bias.astype(jnp.float32).reshape(1, cout)
    g2d = gamma.astype(jnp.float32).reshape(1, cout)
    be2d = beta.astype(jnp.float32).reshape(1, cout)

    # ---- Pallas hot path -----------------------------------------------------
    # NOTE(v6e/v7x): with future stage dims (128/256) the output N axis should
    # be tiled at 256 (full MXU width) and K fed in 256-deep chunks; for the
    # stem (cout=32/64) padding Cout would only inflate HBM writes.
    kernel = partial(_fused_conv_ln_kernel, eps=eps, apply_gelu=apply_gelu,
                     inv_c=1.0 / float(cout))
    out = pl.pallas_call(
        kernel,
        out_shape=jax.ShapeDtypeStruct((M, cout), jnp.bfloat16),
        grid=grid,
        in_specs=[
            pl.BlockSpec((tm, KP), lambda i: (i, 0)),
            pl.BlockSpec((KP, cout), lambda i: (0, 0)),
            pl.BlockSpec((1, cout), lambda i: (0, 0)),
            pl.BlockSpec((1, cout), lambda i: (0, 0)),
            pl.BlockSpec((1, cout), lambda i: (0, 0)),
        ],
        out_specs=pl.BlockSpec((tm, cout), lambda i: (i, 0)),
        compiler_params=pltpu.CompilerParams(
            dimension_semantics=("parallel",),
            # Budgeted against v7x (64 MiB physical / 32 MiB scoped VMEM):
            # per-step footprint even at tm=1024, KP=288 is a few MiB
            # double-buffered, well inside this limit on all generations.
            vmem_limit_bytes=32 * 1024 * 1024,
        ),
    )(patches, w2d, b2d, g2d, be2d)

    return out.reshape(n, ho, wo, cout)


# -----------------------------------------------------------------------------
# Parameter init (deterministic, mirrors CEDNet.init_weights: kaiming_normal
# fan_out / 'linear' gain for convs, zeros for biases, ones/zeros for LN).
# -----------------------------------------------------------------------------
def _kaiming_conv(key, cout, cin, kh, kw):
    fan_out = cout * kh * kw
    std = 1.0 / math.sqrt(fan_out)
    return std * jax.random.normal(key, (cout, cin, kh, kw), dtype=jnp.float32)


def init_cednet_params(key, in_chans=3, p2_dim=32, dim0=64):
    k1, k2, k3 = jax.random.split(key, 3)
    return {
        # stem: Conv(in_chans, 32, 3, 2, 1) + LN + GELU
        "stem_conv1_w": _kaiming_conv(k1, 32, in_chans, 3, 3),
        "stem_conv1_b": jnp.zeros((32,), jnp.float32),
        "stem_ln1_g": jnp.ones((32,), jnp.float32),
        "stem_ln1_b": jnp.zeros((32,), jnp.float32),
        # stem: Conv(32, p2_dim, 3, 2, 1) + LN + GELU
        "stem_conv2_w": _kaiming_conv(k2, p2_dim, 32, 3, 3),
        "stem_conv2_b": jnp.zeros((p2_dim,), jnp.float32),
        "stem_ln2_g": jnp.ones((p2_dim,), jnp.float32),
        "stem_ln2_b": jnp.zeros((p2_dim,), jnp.float32),
        # stages[0][-1]: Conv(p2_dim, dims[0], 2, 2) + LN (no activation)
        "down_w": _kaiming_conv(k3, dim0, p2_dim, 2, 2),
        "down_b": jnp.zeros((dim0,), jnp.float32),
        "down_ln_g": jnp.ones((dim0,), jnp.float32),
        "down_ln_b": jnp.zeros((dim0,), jnp.float32),
    }


# -----------------------------------------------------------------------------
# CEDNet forward (the concretely-defined portion of the reference module).
# NCHW in / NCHW out, NHWC + bf16 internally (single transpose each way).
# -----------------------------------------------------------------------------
def cednet_forward(params, x_nchw):
    x = jnp.transpose(x_nchw, (0, 2, 3, 1))   # NCHW -> NHWC once
    # stem
    x = conv_ln_act_nhwc(x, params["stem_conv1_w"], params["stem_conv1_b"],
                         params["stem_ln1_g"], params["stem_ln1_b"],
                         stride=2, padding=1, apply_gelu=True)
    x = conv_ln_act_nhwc(x, params["stem_conv2_w"], params["stem_conv2_b"],
                         params["stem_ln2_g"], params["stem_ln2_b"],
                         stride=2, padding=1, apply_gelu=True)
    # TODO(synk): the p2-stage BaseBlocks ('NeXtBlock') are not defined in the
    # provided source (BaseBlock = None), so stages[0][:-1] is the identity here.
    c2 = x
    # stages[0][-1]: downsample conv + LN
    x = conv_ln_act_nhwc(c2, params["down_w"], params["down_b"],
                         params["down_ln_g"], params["down_ln_b"],
                         stride=2, padding=0, apply_gelu=False)
    # TODO(synk): Encoder / Decoder stage classes are not defined in the provided
    # source, so the multi-scale stage loop and x_hist outputs cannot be reproduced.
    # Back to NCHW + f32 at the network boundary only.
    return [jnp.transpose(c2, (0, 3, 1, 2)).astype(jnp.float32),
            jnp.transpose(x, (0, 3, 1, 2)).astype(jnp.float32)]


# -----------------------------------------------------------------------------
# Pure-JAX reference (same precision policy: bf16 conv operands, f32 LN/GELU,
# but f32 activation storage -- the kernel path stores bf16 activations, so
# comparisons carry at most ~half a bf16 ulp of extra rounding per tensor).
# -----------------------------------------------------------------------------
def _ref_conv_ln_act(x, w, b, g, beta, *, stride, padding, apply_gelu, eps=1e-6):
    y = jax.lax.conv_general_dilated(
        x.astype(jnp.bfloat16), w.astype(jnp.bfloat16),
        window_strides=(stride, stride),
        padding=((padding, padding), (padding, padding)),
        dimension_numbers=("NCHW", "OIHW", "NCHW"),
        preferred_element_type=jnp.float32,
    ) + b[None, :, None, None]
    u = jnp.mean(y, axis=1, keepdims=True)
    s = jnp.mean((y - u) ** 2, axis=1, keepdims=True)
    y = (y - u) / jnp.sqrt(s + eps)
    y = g[None, :, None, None] * y + beta[None, :, None, None]
    if apply_gelu:
        y = _gelu_tanh(y)
    return y


def cednet_forward_ref(params, x):
    x = _ref_conv_ln_act(x, params["stem_conv1_w"], params["stem_conv1_b"],
                         params["stem_ln1_g"], params["stem_ln1_b"],
                         stride=2, padding=1, apply_gelu=True)
    x = _ref_conv_ln_act(x, params["stem_conv2_w"], params["stem_conv2_b"],
                         params["stem_ln2_g"], params["stem_ln2_b"],
                         stride=2, padding=1, apply_gelu=True)
    c2 = x
    x = _ref_conv_ln_act(c2, params["down_w"], params["down_b"],
                         params["down_ln_g"], params["down_ln_b"],
                         stride=2, padding=0, apply_gelu=False)
    return [c2, x]


if __name__ == "__main__":
    key = jax.random.PRNGKey(0)
    kx, kp = jax.random.split(key)

    # small shapes consistent with the module: NCHW input, in_chans=3
    x = jax.random.normal(kx, (2, 3, 16, 16), dtype=jnp.float32)
    params = init_cednet_params(kp, in_chans=3, p2_dim=32, dim0=64)

    outs = jax.block_until_ready(cednet_forward(params, x))
    refs = jax.block_until_ready(cednet_forward_ref(params, x))

    assert outs[0].shape == (2, 32, 4, 4), outs[0].shape   # c2
    assert outs[1].shape == (2, 64, 2, 2), outs[1].shape   # downsampled p3 input
    for o, r in zip(outs, refs):
        assert o.shape == r.shape
        max_diff = float(jnp.max(jnp.abs(o.astype(jnp.float32) - r.astype(jnp.float32))))
        # bf16 activation storage + bf16 conv operands: tolerance covers both.
        assert max_diff < 3e-2, f"mismatch vs reference: {max_diff}"

    print("KERNEL_OK")
</pallas_src>

<mosaic_0001>
module attributes {stable_mosaic.version = 11 : i64} {
  func.func @_fused_conv_ln_kernel(%arg0: i32, %arg1: memref<64x32xbf16, #tpu.memory_space<vmem>>, %arg2: memref<32x32xbf16, #tpu.memory_space<vmem>>, %arg3: memref<1x32xf32, #tpu.memory_space<vmem>>, %arg4: memref<1x32xf32, #tpu.memory_space<vmem>>, %arg5: memref<1x32xf32, #tpu.memory_space<vmem>>, %arg6: memref<64x32xbf16, #tpu.memory_space<vmem>>) attributes {dimension_semantics = [#tpu.dimension_semantics<parallel>], iteration_bounds = array<i64: 2>, scalar_prefetch = 0 : i64, scratch_operands = 0 : i64, tpu.core_type = #tpu.core_type<tc>, window_params = [{transform_indices = @transform_0, window_bounds = array<i64: 64, 32>}, {pipeline_mode = #tpu.pipeline_mode<synchronous>, transform_indices = @transform_1, window_bounds = array<i64: 32, 32>}, {pipeline_mode = #tpu.pipeline_mode<synchronous>, transform_indices = @transform_2, window_bounds = array<i64: 1, 32>}, {pipeline_mode = #tpu.pipeline_mode<synchronous>, transform_indices = @transform_3, window_bounds = array<i64: 1, 32>}, {pipeline_mode = #tpu.pipeline_mode<synchronous>, transform_indices = @transform_4, window_bounds = array<i64: 1, 32>}, {transform_indices = @transform_5, window_bounds = array<i64: 64, 32>}]} {
    %c0 = arith.constant 0 : index
    %c0_0 = arith.constant 0 : index
    %0 = vector.load %arg1[%c0, %c0_0] : memref<64x32xbf16, #tpu.memory_space<vmem>>, vector<64x32xbf16>
    %c0_1 = arith.constant 0 : index
    %c0_2 = arith.constant 0 : index
    %1 = vector.load %arg2[%c0_1, %c0_2] : memref<32x32xbf16, #tpu.memory_space<vmem>>, vector<32x32xbf16>
    %cst = arith.constant dense<0.000000e+00> : vector<64x32xf32>
    %2 = tpu.matmul %0, %1, %cst {dimension_numbers = #tpu.dot_dimension_numbers<[1], [0], [0], [1], [0, 0, 1, 1], [], []>} : vector<64x32xbf16>, vector<32x32xbf16>, vector<64x32xf32> -> vector<64x32xf32>
    %c0_3 = arith.constant 0 : index
    %c0_4 = arith.constant 0 : index
    %3 = vector.load %arg3[%c0_3, %c0_4] : memref<1x32xf32, #tpu.memory_space<vmem>>, vector<1x32xf32>
    %4 = vector.broadcast %3 : vector<1x32xf32> to vector<64x32xf32>
    %5 = arith.addf %2, %4 : vector<64x32xf32>
    %cst_5 = arith.constant dense<0.000000e+00> : vector<64xf32>
    %6 = vector.multi_reduction <add>, %5, %cst_5 [1] : vector<64x32xf32> to vector<64xf32>
    %7 = vector.shape_cast %6 : vector<64xf32> to vector<64x1xf32>
    %8 = arith.mulf %5, %5 : vector<64x32xf32>
    %cst_6 = arith.constant dense<0.000000e+00> : vector<64xf32>
    %9 = vector.multi_reduction <add>, %8, %cst_6 [1] : vector<64x32xf32> to vector<64xf32>
    %10 = vector.shape_cast %9 : vector<64xf32> to vector<64x1xf32>
    %cst_7 = arith.constant 3.125000e-02 : f32
    %11 = vector.broadcast %cst_7 : f32 to vector<64x1xf32>
    %12 = arith.mulf %7, %11 : vector<64x1xf32>
    %cst_8 = arith.constant 3.125000e-02 : f32
    %13 = vector.broadcast %cst_8 : f32 to vector<64x1xf32>
    %14 = arith.mulf %10, %13 : vector<64x1xf32>
    %15 = arith.mulf %12, %12 : vector<64x1xf32>
    %16 = arith.subf %14, %15 : vector<64x1xf32>
    %cst_9 = arith.constant 0.000000e+00 : f32
    %17 = vector.broadcast %cst_9 : f32 to vector<64x1xf32>
    %18 = arith.maximumf %16, %17 : vector<64x1xf32>
    %19 = vector.broadcast %12 : vector<64x1xf32> to vector<64x32xf32>
    %20 = arith.subf %5, %19 : vector<64x32xf32>
    %cst_10 = arith.constant 9.99999997E-7 : f32
    %21 = vector.broadcast %cst_10 : f32 to vector<64x1xf32>
    %22 = arith.addf %18, %21 : vector<64x1xf32>
    %23 = math.rsqrt %22 : vector<64x1xf32>
    %24 = vector.broadcast %23 : vector<64x1xf32> to vector<64x32xf32>
    %25 = arith.mulf %20, %24 : vector<64x32xf32>
    %c0_11 = arith.constant 0 : index
    %c0_12 = arith.constant 0 : index
    %26 = vector.load %arg4[%c0_11, %c0_12] : memref<1x32xf32, #tpu.memory_space<vmem>>, vector<1x32xf32>
    %27 = vector.broadcast %26 : vector<1x32xf32> to vector<64x32xf32>
    %28 = arith.mulf %25, %27 : vector<64x32xf32>
    %c0_13 = arith.constant 0 : index
    %c0_14 = arith.constant 0 : index
    %29 = vector.load %arg5[%c0_13, %c0_14] : memref<1x32xf32, #tpu.memory_space<vmem>>, vector<1x32xf32>
    %30 = vector.broadcast %29 : vector<1x32xf32> to vector<64x32xf32>
    %31 = arith.addf %28, %30 : vector<64x32xf32>
    %cst_15 = arith.constant 5.000000e-01 : f32
    %32 = vector.broadcast %cst_15 : f32 to vector<64x32xf32>
    %33 = arith.mulf %32, %31 : vector<64x32xf32>
    %cst_16 = arith.constant 4.471500e-02 : f32
    %34 = vector.broadcast %cst_16 : f32 to vector<64x32xf32>
    %35 = arith.mulf %34, %31 : vector<64x32xf32>
    %36 = arith.mulf %35, %31 : vector<64x32xf32>
    %37 = arith.mulf %36, %31 : vector<64x32xf32>
    %38 = arith.addf %31, %37 : vector<64x32xf32>
    %cst_17 = arith.constant 0.797884583 : f32
    %39 = vector.broadcast %cst_17 : f32 to vector<64x32xf32>
    %40 = arith.mulf %39, %38 : vector<64x32xf32>
    %41 = math.tanh %40 : vector<64x32xf32>
    %cst_18 = arith.constant 1.000000e+00 : f32
    %42 = vector.broadcast %cst_18 : f32 to vector<64x32xf32>
    %43 = arith.addf %42, %41 : vector<64x32xf32>
    %44 = arith.mulf %33, %43 : vector<64x32xf32>
    %45 = arith.truncf %44 : vector<64x32xf32> to vector<64x32xbf16>
    %c0_19 = arith.constant 0 : index
    %c0_20 = arith.constant 0 : index
    %46 = vector.load %arg6[%c0_19, %c0_20] : memref<64x32xbf16, #tpu.memory_space<vmem>>, vector<64x32xbf16>
    tpu.vector_store %arg6[%c0_19, %c0_20], %45 {strides = array<i32>} : memref<64x32xbf16, #tpu.memory_space<vmem>>, vector<64x32xbf16>,
    return
  }
  func.func @transform_0(%arg0: i32) -> (i32, i32) {
    %c0_i32 = arith.constant 0 : i32
    %c0_i32_0 = arith.constant 0 : i32
    return %arg0, %c0_i32 : i32, i32
  }
  func.func @transform_1(%arg0: i32) -> (i32, i32) {
    %c0_i32 = arith.constant 0 : i32
    %c0_i32_0 = arith.constant 0 : i32
    %c0_i32_1 = arith.constant 0 : i32
    return %c0_i32, %c0_i32_0 : i32, i32
  }
  func.func @transform_2(%arg0: i32) -> (i32, i32) {
    %c0_i32 = arith.constant 0 : i32
    %c0_i32_0 = arith.constant 0 : i32
    %c0_i32_1 = arith.constant 0 : i32
    return %c0_i32, %c0_i32_0 : i32, i32
  }
  func.func @transform_3(%arg0: i32) -> (i32, i32) {
    %c0_i32 = arith.constant 0 : i32
    %c0_i32_0 = arith.constant 0 : i32
    %c0_i32_1 = arith.constant 0 : i32
    return %c0_i32, %c0_i32_0 : i32, i32
  }
  func.func @transform_4(%arg0: i32) -> (i32, i32) {
    %c0_i32 = arith.constant 0 : i32
    %c0_i32_0 = arith.constant 0 : i32
    %c0_i32_1 = arith.constant 0 : i32
    return %c0_i32, %c0_i32_0 : i32, i32
  }
  func.func @transform_5(%arg0: i32) -> (i32, i32) {
    %c0_i32 = arith.constant 0 : i32
    %c0_i32_0 = arith.constant 0 : i32
    return %arg0, %c0_i32 : i32, i32
  }
}

</mosaic_0001>

<bundles_post_ra>
// kernel: tpu_custom_call.1
= control target key start
LH: loop header
LB: loop body
LE: loop exit
PB: predicated region body
PF: predicated region fallthrough
CT: control target
= control target key end

     0   :  { %s831_s18 = smov 0   ;;  %s1067_s0 = inlined_call_operand.vmem [shape: bf16[128,32], index: 0, kind: input, shape index: {}]   ;;  %s1068_s1 = inlined_call_operand.vmem [shape: bf16[32,32], index: 1, kind: input, shape index: {}]   ;;  %s1069_s2 = inlined_call_operand.vmem [shape: f32[1,32], index: 2, kind: input, shape index: {}]   ;;  %s1070_s3 = inlined_call_operand.vmem [shape: f32[1,32], index: 3, kind: input, shape index: {}]   ;;  %s1071_s4 = inlined_call_operand.vmem [shape: f32[1,32], index: 4, kind: input, shape index: {}]   ;;  %s1072_s5 = inlined_call_operand.vmem [shape: bf16[128,32], index: 5, kind: output, shape index: {}]  }
   0x1 LB: > { %s685_s19 = sadd.s32 4294967295, %s799_s18   ;;  %p689_p0 = scmp.ge.s32.totalorder %s799_s18, 1  ;;  %s799_s18 = sphi %s831_s18, %s15_s18  }
   0x2   : > { %p188_p1 = scmp.lt.s32.totalorder %s799_s18, 3 }
   0x4   : > { %p189_p2 = pnand %p689_p0, %p188_p1 }
   0x5   : > { %v755_v0 = vld [vmem:[%s1068_s1] sm:$0xff] (!%p189_p2)   ;;  %s690_s22 = sshll.u32 (!%p189_p2), %s685_s19, 3  ;;  %v756_v1 = vld [vmem:[%s1068_s1 + $0x8] sm:$0xff] (!%p189_p2)   ;;  %vm280_vm0 = vcmask (!%p189_p2), 261120   ;;  %vm620_vm1 = vcmask (!%p189_p2), 257024  }
   0x6   : > { %192 = sbr.rel (%p189_p2) target bundleno = 457 (0x1c9), region = 40  ;;  %p217_p3 = scmp.lt.s32.totalorder (!%p189_p2), %s690_s22, 15  ;;  %731 = vmatprep.subr.bf16.mxu0 (!%p189_p2), %v755_v0  ;;  %743 = vmatprep.subr.bf16.mxu1 (!%p189_p2), %v755_v0  ;;  %v694_v6 = vld [vmem:[%s1069_s2] ss:$0 sm:$0xff] (!%p189_p2) }
   0x7   : > { %732 = vmatpush3.bf16.msra.mxu0 (!%p189_p2), %v755_v0  ;;  %745 = vmatpush3.bf16.msra.mxu1 (!%p189_p2), %v755_v0 }
   0x8   : > { %733 = vmatprep.subr.bf16.mxu0 (!%p189_p2), %v756_v1  ;;  %744 = vmatprep.subr.bf16.mxu1 (!%p189_p2), %v756_v1 }
   0xb   : > { %734 = vmatpush3.bf16.msra.mxu0 (!%p189_p2), %v756_v1  ;;  %746 = vmatpush3.bf16.msra.mxu1 (!%p189_p2), %v756_v1 }
   0xd   : > { %s1074_s22 = smov (!%p217_p3, %s690_s22), 15 }
   0xe   : > { %s691_s25 = sshll.u32 %s1074_s22, 2 }
   0xf   : > { %s220_s28 = scalar_lea.vmem %s1067_s0, %s691_s25  ;;  %s1039_s12 = scalar_lea.vmem %s1072_s5, %s691_s25 }
  0x10   : > { %v757_v2 = vld [vmem:[%s220_s28] sm:$0xff]   ;;  %v758_v3 = vld [vmem:[%s220_s28 + $0x10] sm:$0xff]   ;;  %v759_v4 = vld [vmem:[%s220_s28 + $0x8] sm:$0xff]  }
  0x11   : > { %735 = vmatprep.mubr.msk.bf16.mxu0 %vm280_vm0, %v757_v2  ;;  %739 = vmatprep.mubr.msk.bf16.mxu1 %vm280_vm0, %v758_v3  ;;  %v760_v5 = vld [vmem:[%s220_s28 + $0x18] sm:$0xff]  }
  0x12   : > { %736 = vmatmul.mubr.msk.bf16.vlgmr.msra.gmra.mrb[0].mxu0 %vm280_vm0, %v759_v4  ;;  %740 = vmatmul.mubr.msk.bf16.vlgmr.msra.gmra.mrb[0].mxu1 %vm280_vm0, %v760_v5 }
  0xe5   : > { %v737_v7 = vpop.f32.mrb[0].mxu0  ;;  %v741_v9 = vpop.f32.mrb[0].mxu1 }
  0xe6   : > { %v860_v8 = vadd.f32 %v737_v7, %v694_v6  ;;  %v327_v10 = vpop.f32.mrb[1].mxu0  ;;  %v862_v11 = vadd.f32 %v741_v9, %v694_v6  ;;  %v343_v12 = vpop.f32.mrb[1].mxu1 }
  0xe7   : > { %v738_v13 = vpop.f32.mrb[2].mxu0  ;;  %v742_v15 = vpop.f32.mrb[2].mxu1  ;;  %v868_v18 = vadd.f32 %v694_v6, %v327_v10  ;;  %v876_v23 = vadd.f32 %v694_v6, %v343_v12 }
  0xe8   : > { %v864_v14 = vadd.f32 %v738_v13, %v694_v6  ;;  %v330_v16 = vpop.f32.mrb[3].mxu0  ;;  %v364_v17 = vsel %vm280_vm0, %v860_v8, 0.0  ;;  %v346_v19 = vpop.f32.mrb[3].mxu1  ;;  %v376_v20 = vsel %vm280_vm0, %v862_v11, 0.0  ;;  %v872_v21 = vadd.f32 %v742_v15, %v694_v6 }
  0xe9   : > { %365 = vadd.xlane.f32.xlu1 %v364_v17  ;;  %377 = vadd.xlane.f32.xlu0 %v376_v20  ;;  %v358_v24 = vsel %vm280_vm0, %v868_v18, 0.0  ;;  %v880_v25 = vadd.f32 %v694_v6, %v346_v19  ;;  %v370_v27 = vsel %vm280_vm0, %v876_v23, 0.0  ;;  %v384_v28 = vmul.f32 %v860_v8, %v860_v8 }
  0xea   : > { %v367_v22 = vsel %vm280_vm0, %v864_v14, 0.0  ;;  %v379_v26 = vsel %vm280_vm0, %v872_v21, 0.0  ;;  %v888_v29 = vadd.f32 %v694_v6, %v330_v16  ;;  %v385_v31 = vmul.f32 %v864_v14, %v864_v14 }
  0xeb   : > { %v373_v30 = vsel %vm280_vm0, %v880_v25, 0.0  ;;  %v396_v32 = vsel %vm280_vm0, %v384_v28, 0.0  ;;  %v382_v36 = vmul.f32 %v868_v18, %v868_v18  ;;  %v387_v38 = vmul.f32 %v880_v25, %v880_v25 }
  0xec   : > { %v399_v33 = vsel %vm280_vm0, %v385_v31, 0.0  ;;  %v383_v34 = vmul.f32 %v888_v29, %v888_v29  ;;  %v361_v35 = vsel %vm280_vm0, %v888_v29, 0.0  ;;  %v386_v40 = vmul.f32 %v876_v23, %v876_v23 }
  0xed   : > { %368 = vadd.xlane.f32.xlu1 %v367_v22  ;;  %359 = vadd.xlane.f32.xlu0 %v358_v24  ;;  %v390_v39 = vsel %vm280_vm0, %v382_v36, 0.0  ;;  %v405_v41 = vsel %vm280_vm0, %v387_v38, 0.0  ;;  %v389_v42 = vmul.f32 %v872_v21, %v872_v21  ;;  %v388_v44 = vmul.f32 %v862_v11, %v862_v11 }
  0xee   : > { %v393_v37 = vsel %vm280_vm0, %v383_v34, 0.0  ;;  %v402_v43 = vsel %vm280_vm0, %v386_v40, 0.0 }
  0xef   : > { %v411_v45 = vsel %vm280_vm0, %v389_v42, 0.0  ;;  %v408_v46 = vsel %vm280_vm0, %v388_v44, 0.0 }
  0xf1   : > { %380 = vadd.xlane.f32.xlu1 %v379_v26  ;;  %371 = vadd.xlane.f32.xlu0 %v370_v27 }
  0xf5   : > { %374 = vadd.xlane.f32.xlu1 %v373_v30  ;;  %397 = vadd.xlane.f32.xlu0 %v396_v32 }
  0xf9   : > { %400 = vadd.xlane.f32.xlu1 %v399_v33  ;;  %362 = vadd.xlane.f32.xlu0 %v361_v35 }
  0xfd   : > { %394 = vadd.xlane.f32.xlu1 %v393_v37  ;;  %391 = vadd.xlane.f32.xlu0 %v390_v39 }
 0x101   : > { %406 = vadd.xlane.f32.xlu1 %v405_v41  ;;  %403 = vadd.xlane.f32.xlu0 %v402_v43 }
 0x105   : > { %412 = vadd.xlane.f32.xlu1 %v411_v45  ;;  %409 = vadd.xlane.f32.xlu0 %v408_v46 }
 0x176   : > { %v366_v47 = vpop.xlane.xlu1 %365  ;;  %v378_v48 = vpop.xlane.xlu0 %377 }
 0x177   : > { %v416_v53 = vmul.f32 0.03125, %v366_v47  ;;  %v936_v31 = vmul.f32 0.03125, %v378_v48 }
 0x179   : > { %v432_v57 = vmul.f32 %v416_v53, %v416_v53  ;;  %v436_v44 = vmul.f32 %v936_v31, %v936_v31  ;;  %v456_v47 = vsub.f32 %v860_v8, %v416_v53  ;;  %v955_v8 = vld [vmem:[%s1071_s4] ss:$0 sm:$0xff] }
 0x17a   : > { %v369_v49 = vpop.xlane.xlu1 %368  ;;  %v360_v50 = vpop.xlane.xlu0 %359 }
 0x17b   : > { %v916_v55 = vmul.f32 0.03125, %v369_v49  ;;  %v920_v0 = vmul.f32 0.03125, %v360_v50 }
 0x17d   : > { %v433_v61 = vmul.f32 %v916_v55, %v916_v55  ;;  %v430_v13 = vmul.f32 %v920_v0, %v920_v0 }
 0x17e   : > { %v381_v51 = vpop.xlane.xlu1 %380  ;;  %v372_v52 = vpop.xlane.xlu0 %371 }
 0x17f   : > { %v930_v15 = vmul.f32 0.03125, %v372_v52  ;;  %v932_v20 = vmul.f32 0.03125, %v381_v51  ;;  %v948_v51 = vld [vmem:[%s1070_s3] ss:$0 sm:$0xff] }
 0x181   : > { %v434_v32 = vmul.f32 %v930_v15, %v930_v15  ;;  %v437_v40 = vmul.f32 %v932_v20, %v932_v20 }
 0x182   : > { %v375_v54 = vpop.xlane.xlu1 %374  ;;  %v398_v56 = vpop.xlane.xlu0 %397 }
 0x183   : > { %v424_v58 = vmul.f32 0.03125, %v398_v56  ;;  %v924_v6 = vmul.f32 0.03125, %v375_v54 }
 0x185   : > { %v440_v59 = vsub.f32 %v424_v58, %v432_v57  ;;  %v435_v26 = vmul.f32 %v924_v6, %v924_v6  ;;  %v457_v58 = vsub.f32 %v864_v14, %v916_v55 }
 0x186   : > { %v401_v60 = vpop.xlane.xlu1 %400  ;;  %v363_v63 = vpop.xlane.xlu0 %362 }
 0x187   : > { %v425_v62 = vmul.f32 0.03125, %v401_v60  ;;  %v448_v1 = vmax.f32 %v440_v59, 0.0  ;;  %v922_v2 = vmul.f32 0.03125, %v363_v63 }
 0x189   : > { %v441_v3 = vsub.f32 %v425_v62, %v433_v61  ;;  %v464_v4 = vadd.f32 1e-06, %v448_v1  ;;  %v431_v9 = vmul.f32 %v922_v2, %v922_v2  ;;  %v455_v14 = vsub.f32 %v888_v29, %v922_v2 }
 0x18a   : > { %v395_v5 = vpop.xlane.xlu1 %394  ;;  %v392_v12 = vpop.xlane.xlu0 %391 }
 0x18b   : > { %v449_v7 = vmax.f32 %v441_v3, 0.0  ;;  %v423_v10 = vmul.f32 0.03125, %v395_v5  ;;  %761 = vrsqrt.f32 %v464_v4  ;;  %v422_v16 = vmul.f32 0.03125, %v392_v12 }
 0x18c   : > { %v454_v4 = vsub.f32 %v868_v18, %v920_v0  ;;  %v458_v18 = vsub.f32 %v876_v23, %v930_v15  ;;  %v461_v23 = vsub.f32 %v872_v21, %v932_v20 }
 0x18d   : > { %v465_v17 = vadd.f32 1e-06, %v449_v7  ;;  %v439_v19 = vsub.f32 %v423_v10, %v431_v9  ;;  %v438_v22 = vsub.f32 %v422_v16, %v430_v13  ;;  %v459_v16 = vsub.f32 %v880_v25, %v924_v6 }
 0x18e   : > { %v407_v24 = vpop.xlane.xlu1 %406  ;;  %v404_v30 = vpop.xlane.xlu0 %403 }
 0x18f   : > { %763 = vrsqrt.f32 %v465_v17  ;;  %v447_v27 = vmax.f32 %v439_v19, 0.0  ;;  %v427_v28 = vmul.f32 0.03125, %v407_v24  ;;  %v446_v33 = vmax.f32 %v438_v22, 0.0 }
 0x190   : > { %v426_v34 = vmul.f32 0.03125, %v404_v30 }
 0x191   : > { %v463_v35 = vadd.f32 1e-06, %v447_v27  ;;  %v443_v36 = vsub.f32 %v427_v28, %v435_v26  ;;  %v462_v37 = vadd.f32 1e-06, %v446_v33 }
 0x192   : > { %v442_v38 = vsub.f32 %v426_v34, %v434_v32  ;;  %v413_v39 = vpop.xlane.xlu1 %412  ;;  %v410_v43 = vpop.xlane.xlu0 %409  ;;  %v460_v34 = vsub.f32 %v862_v11, %v936_v31 }
 0x193   : > { %765 = vrsqrt.f32 %v463_v35  ;;  %v451_v41 = vmax.f32 %v443_v36, 0.0  ;;  %v429_v42 = vmul.f32 0.03125, %v413_v39  ;;  %v428_v46 = vmul.f32 0.03125, %v410_v43 }
 0x194   : > { %767 = vrsqrt.f32 %v462_v37  ;;  %v450_v45 = vmax.f32 %v442_v38, 0.0 }
 0x195   : > { %v467_v48 = vadd.f32 1e-06, %v451_v41  ;;  %v445_v49 = vsub.f32 %v429_v42, %v437_v40  ;;  %v762_v50 = vpop.eup %761  ;;  %v444_v54 = vsub.f32 %v428_v46, %v436_v44 }
 0x196   : > { %v466_v52 = vadd.f32 1e-06, %v450_v45  ;;  %v480_v56 = vmul.f32 %v762_v50, %v456_v47 }
 0x197   : > { %769 = vrsqrt.f32 %v467_v48  ;;  %v453_v57 = vmax.f32 %v445_v49, 0.0  ;;  %v452_v53 = vmax.f32 %v444_v54, 0.0 }
 0x198   : > { %771 = vrsqrt.f32 %v466_v52  ;;  %v495_v60 = vmul.f32 %v948_v51, %v480_v56 }
 0x199   : > { %v764_v59 = vpop.eup %763  ;;  %v469_v61 = vadd.f32 1e-06, %v453_v57  ;;  %v468_v63 = vadd.f32 1e-06, %v452_v53 }
 0x19a   : > { %v481_v62 = vmul.f32 %v764_v59, %v457_v58  ;;  %v959_v1 = vadd.f32 %v955_v8, %v495_v60 }
 0x19b   : > { %773 = vrsqrt.f32 %v469_v61 }
 0x19c   : > { %v496_v3 = vmul.f32 %v948_v51, %v481_v62  ;;  %775 = vrsqrt.f32 %v468_v63  ;;  %v526_v5 = vmul.f32 0.044715, %v959_v1 }
 0x19d   : > { %v766_v55 = vpop.eup %765 }
 0x19e   : > { %v768_v7 = vpop.eup %767  ;;  %v968_v9 = vadd.f32 %v955_v8, %v496_v3  ;;  %v479_v10 = vmul.f32 %v766_v55, %v455_v14  ;;  %v534_v12 = vmul.f32 %v526_v5, %v959_v1 }
 0x19f   : > { %v478_v13 = vmul.f32 %v768_v7, %v454_v4  ;;  %v518_v7 = vmul.f32 0.5, %v959_v1 }
 0x1a0   : > { %v527_v29 = vmul.f32 0.044715, %v968_v9  ;;  %v494_v2 = vmul.f32 %v948_v51, %v479_v10  ;;  %v542_v0 = vmul.f32 %v534_v12, %v959_v1 }
 0x1a1   : > { %v770_v17 = vpop.eup %769  ;;  %v493_v19 = vmul.f32 %v948_v51, %v478_v13 }
 0x1a2   : > { %v772_v22 = vpop.eup %771  ;;  %v535_v24 = vmul.f32 %v527_v29, %v968_v9  ;;  %v981_v26 = vadd.f32 %v955_v8, %v494_v2  ;;  %v483_v27 = vmul.f32 %v770_v17, %v459_v16  ;;  %v550_v25 = vadd.f32 %v542_v0, %v959_v1 }
 0x1a3   : > { %v985_v6 = vadd.f32 %v955_v8, %v493_v19  ;;  %v482_v28 = vmul.f32 %v772_v22, %v458_v18  ;;  %v519_v1 = vmul.f32 0.5, %v968_v9 }
 0x1a4   : > { %v543_v15 = vmul.f32 %v535_v24, %v968_v9  ;;  %v525_v30 = vmul.f32 0.044715, %v981_v26  ;;  %v498_v32 = vmul.f32 %v948_v51, %v483_v27  ;;  %v558_v35 = vmul.f32 0.7978846, %v550_v25 }
 0x1a5   : > { %v774_v33 = vpop.eup %773  ;;  %v524_v36 = vmul.f32 0.044715, %v985_v6  ;;  %v497_v37 = vmul.f32 %v948_v51, %v482_v28  ;;  %v517_v28 = vmul.f32 0.5, %v981_v26 }
 0x1a6   : > { %v776_v38 = vpop.eup %775  ;;  %v551_v39 = vadd.f32 %v543_v15, %v968_v9  ;;  %v533_v21 = vmul.f32 %v525_v30, %v981_v26  ;;  %v999_v20 = vadd.f32 %v955_v8, %v498_v32  ;;  %v485_v40 = vmul.f32 %v774_v33, %v461_v23 }
 0x1a7   : > { %777 = vtanh.f32 %v558_v35  ;;  %v532_v41 = vmul.f32 %v524_v36, %v985_v6  ;;  %v1003_v42 = vadd.f32 %v955_v8, %v497_v37  ;;  %v484_v11 = vmul.f32 %v776_v38, %v460_v34 }
 0x1a8   : > { %v559_v31 = vmul.f32 0.7978846, %v551_v39  ;;  %v541_v43 = vmul.f32 %v533_v21, %v981_v26  ;;  %v529_v44 = vmul.f32 0.044715, %v999_v20  ;;  %v500_v47 = vmul.f32 %v948_v51, %v485_v40 }
 0x1a9   : > { %v540_v45 = vmul.f32 %v532_v41, %v985_v6  ;;  %v528_v46 = vmul.f32 0.044715, %v1003_v42  ;;  %v499_v50 = vmul.f32 %v948_v51, %v484_v11  ;;  %v516_v9 = vmul.f32 0.5, %v985_v6 }
 0x1aa   : > { %779 = vtanh.f32 %v559_v31  ;;  %v549_v48 = vadd.f32 %v541_v43, %v981_v26  ;;  %v537_v49 = vmul.f32 %v529_v44, %v999_v20  ;;  %v1016_v56 = vadd.f32 %v955_v8, %v500_v47 }
 0x1ab   : > { %v548_v52 = vadd.f32 %v540_v45, %v985_v6  ;;  %v536_v54 = vmul.f32 %v528_v46, %v1003_v42  ;;  %v1020_v53 = vadd.f32 %v955_v8, %v499_v50  ;;  %v521_v36 = vmul.f32 0.5, %v999_v20 }
 0x1ac   : > { %v557_v57 = vmul.f32 0.7978846, %v549_v48  ;;  %v545_v58 = vmul.f32 %v537_v49, %v999_v20  ;;  %v531_v61 = vmul.f32 0.044715, %v1016_v56  ;;  %v520_v26 = vmul.f32 0.5, %v1003_v42 }
 0x1ad   : > { %v556_v59 = vmul.f32 0.7978846, %v548_v52  ;;  %v544_v60 = vmul.f32 %v536_v54, %v1003_v42  ;;  %v530_v62 = vmul.f32 0.044715, %v1020_v53 }
 0x1ae   : > { %781 = vtanh.f32 %v557_v57  ;;  %v553_v51 = vadd.f32 %v545_v58, %v999_v20  ;;  %v539_v3 = vmul.f32 %v531_v61, %v1016_v56  ;;  %v523_v20 = vmul.f32 0.5, %v1016_v56 }
 0x1af   : > { %783 = vtanh.f32 %v556_v59  ;;  %v552_v63 = vadd.f32 %v544_v60, %v1003_v42  ;;  %v538_v8 = vmul.f32 %v530_v62, %v1020_v53  ;;  %v522_v42 = vmul.f32 0.5, %v1020_v53 }
 0x1b0   : > { %v561_v14 = vmul.f32 0.7978846, %v553_v51  ;;  %v547_v5 = vmul.f32 %v539_v3, %v1016_v56 }
 0x1b1   : > { %v778_v55 = vpop.eup %777  ;;  %v560_v4 = vmul.f32 0.7978846, %v552_v63  ;;  %v546_v12 = vmul.f32 %v538_v8, %v1020_v53 }
 0x1b2   : > { %v574_v10 = vadd.f32 1.0, %v778_v55  ;;  %785 = vtanh.f32 %v561_v14  ;;  %v555_v13 = vadd.f32 %v547_v5, %v1016_v56 }
 0x1b3   : > { %787 = vtanh.f32 %v560_v4  ;;  %v554_v2 = vadd.f32 %v546_v12, %v1020_v53 }
 0x1b4   : > { %v780_v16 = vpop.eup %779  ;;  %v582_v29 = vmul.f32 %v574_v10, %v518_v7  ;;  %v563_v18 = vmul.f32 0.7978846, %v555_v13 }
 0x1b5   : > { %v575_v17 = vadd.f32 1.0, %v780_v16  ;;  %v562_v19 = vmul.f32 0.7978846, %v554_v2 }
 0x1b6   : > { %v719_v0 = vpack.c.bf16 %v582_v29, %v582_v29  ;;  %789 = vtanh.f32 %v563_v18 }
 0x1b7   : > { %v583_v22 = vmul.f32 %v575_v17, %v519_v1  ;;  %791 = vtanh.f32 %v562_v19 }
 0x1b8   : > { %v782_v24 = vpop.eup %781  ;;  %623 = vst.msk [vmem:[%s1039_s12 + $0x8] sm:$0xf] %vm620_vm1, %v719_v0 }
 0x1b9   : > { %v784_v27 = vpop.eup %783  ;;  %v720_v25 = vpack.c.bf16 %v583_v22, %v583_v22  ;;  %v573_v23 = vadd.f32 1.0, %v782_v24 }
 0x1ba   : > { %v572_v15 = vadd.f32 1.0, %v784_v27 }
 0x1bb   : > { %624 = vst.msk [vmem:[%s1039_s12 + $0xc] sm:$0xf] %vm620_vm1, %v720_v25  ;;  %v581_v30 = vmul.f32 %v573_v23, %v517_v28 }
 0x1bc   : > { %v786_v32 = vpop.eup %785  ;;  %v580_v33 = vmul.f32 %v572_v15, %v516_v9 }
 0x1bd   : > { %v788_v34 = vpop.eup %787  ;;  %v718_v35 = vpack.c.bf16 %v581_v30, %v581_v30  ;;  %v577_v37 = vadd.f32 1.0, %v786_v32 }
 0x1be   : > { %v717_v38 = vpack.c.bf16 %v580_v33, %v580_v33  ;;  %v576_v39 = vadd.f32 1.0, %v788_v34 }
 0x1bf   : > { %622 = vst.msk [vmem:[%s1039_s12 + $0x4] sm:$0xf] %vm620_vm1, %v718_v35  ;;  %v585_v6 = vmul.f32 %v577_v37, %v521_v36 }
 0x1c0   : > { %621 = vst.msk [vmem:[%s1039_s12] sm:$0xf] %vm620_vm1, %v717_v38  ;;  %v584_v21 = vmul.f32 %v576_v39, %v520_v26  ;;  %v790_v40 = vpop.eup %789 }
 0x1c1   : > { %v722_v41 = vpack.c.bf16 %v585_v6, %v585_v6  ;;  %v792_v11 = vpop.eup %791  ;;  %v579_v43 = vadd.f32 1.0, %v790_v40 }
 0x1c2   : > { %v721_v31 = vpack.c.bf16 %v584_v21, %v584_v21  ;;  %v578_v44 = vadd.f32 1.0, %v792_v11 }
 0x1c3   : > { %626 = vst.msk [vmem:[%s1039_s12 + $0x14] sm:$0xf] %vm620_vm1, %v722_v41  ;;  %v587_v45 = vmul.f32 %v579_v43, %v523_v20 }
 0x1c4   : > { %625 = vst.msk [vmem:[%s1039_s12 + $0x10] sm:$0xf] %vm620_vm1, %v721_v31  ;;  %v586_v46 = vmul.f32 %v578_v44, %v522_v42 }
 0x1c5   : > { %v724_v47 = vpack.c.bf16 %v587_v45, %v587_v45 }
 0x1c6   : > { %v723_v48 = vpack.c.bf16 %v586_v46, %v586_v46 }
 0x1c7   : > { %628 = vst.msk [vmem:[%s1039_s12 + $0x1c] sm:$0xf] %vm620_vm1, %v724_v47 }
 0x1c8   : > { %627 = vst.msk [vmem:[%s1039_s12 + $0x18] sm:$0xf] %vm620_vm1, %v723_v48 }
 0x1c9 PF: > { %s15_s18 = sadd.s32 1, %s799_s18  }
 0x1ca   : > { %p12_p4 = scmp.ge.s32.totalorder %s15_s18, 4  }
 0x1cc   :  { %14 = sbr.rel (!%p12_p4) target bundleno = 1 (0x1), region = 70 }

</bundles_post_ra>
